<compile_context>
chip_gen: v7x
topology: tpu7x:2x2x1
jax: 0.10.0
libtpu: 0.0.40
codegen_flags: <defaults>
</compile_context>

<pallas_src>
import functools
import math
import operator

import jax
import jax.numpy as jnp
from jax.experimental import pallas as pl
from jax.experimental.pallas import tpu as pltpu

_LANE = 128
_SUBLANE = 8
_LANE_CANDIDATES = (4096, 2048, 1024, 512, 256, 128)   # wider lanes preferred
_BLOCK_TARGET_ELEMS = 256 * 1024                       # ~1 MiB (f32) per input block
_VMEM_BUDGET_BYTES = 12 * 1024 * 1024                  # headroom under 16 MiB v5e floor


def _make_sum_kernel(n_inputs):
    """Kernel summing `n_inputs` tiles elementwise and scaling by an SMEM weight."""

    def kernel(w_ref, *refs):
        x_refs = refs[:n_inputs]
        o_ref = refs[n_inputs]
        acc = x_refs[0][...].astype(jnp.float32)
        for r in x_refs[1:]:
            acc = acc + r[...].astype(jnp.float32)
        o_ref[...] = (acc * w_ref[0]).astype(o_ref.dtype)

    return kernel


def _choose_layout(size):
    """Pick a lane width L (multiple of 128).

    Prefer an L that divides `size` exactly (zero-copy reshape) while keeping
    at least 8 rows for full sublane utilisation.  Fall back to a minimal
    zero-pad to a multiple of 128 otherwise.
    Returns (lane, pad_elements).
    """
    for lane in _LANE_CANDIDATES:
        if size % lane == 0 and size // lane >= _SUBLANE:
            return lane, 0
    padded = ((size + _LANE - 1) // _LANE) * _LANE
    return _LANE, padded - size


def _choose_row_tile(rows, lane, n_inputs):
    """Row-tile size: as large as the double-buffered VMEM budget allows."""
    # (n_inputs + 1 output) arrays, each double-buffered, 4 bytes/elem.
    budget_elems = (_VMEM_BUDGET_BYTES // 4) // (2 * (n_inputs + 1))
    target = max(lane, min(_BLOCK_TARGET_ELEMS, budget_elems))
    tr = max(_SUBLANE, (target // lane) // _SUBLANE * _SUBLANE)
    if rows <= tr:
        return rows          # single block == full row extent (always legal)
    return tr                # multiple of 8; ragged edge handled by Pallas masking


def _pallas_weighted_sum(flats_2d, weight_1d, out_dtype, tr):
    """loss_weight * elementwise sum of N (rows, lane) arrays -> (rows, lane)."""
    n = len(flats_2d)
    rows, lane = flats_2d[0].shape
    grid = (pl.cdiv(rows, tr),)

    in_specs = [pl.BlockSpec(memory_space=pltpu.MemorySpace.SMEM)]  # loss_weight
    in_specs += [pl.BlockSpec((tr, lane), lambda r: (r, 0)) for _ in range(n)]
    out_spec = pl.BlockSpec((tr, lane), lambda r: (r, 0))

    return pl.pallas_call(
        _make_sum_kernel(n),
        out_shape=jax.ShapeDtypeStruct((rows, lane), out_dtype),
        grid_spec=pl.GridSpec(grid=grid, in_specs=in_specs, out_specs=out_spec),
        compiler_params=pltpu.CompilerParams(
            dimension_semantics=("parallel",),   # row tiles shard across v7x's 2 TCs
        ),
    )(weight_1d, *flats_2d)


def det_loss(loss_dict, loss_weight=1.0, *, min_pallas_elements=1024):
    """JAX/Pallas equivalent of DETLoss.forward.

    Returns loss_weight * (broadcasting) elementwise sum of loss_dict values.
    """
    values = [jnp.asarray(v) for v in loss_dict.values()]
    if not values:
        raise ValueError("loss_dict must contain at least one loss")

    out_dtype = jnp.result_type(*values)
    if not jnp.issubdtype(out_dtype, jnp.inexact):
        # Python-float weight * integer tensor promotes to float in PyTorch.
        out_dtype = jnp.float32

    # Mirror PyTorch sum() broadcasting (no-op when shapes already match).
    out_shape = jnp.broadcast_shapes(*[v.shape for v in values])
    values = [jnp.broadcast_to(v, out_shape) for v in values]
    size = math.prod(out_shape) if out_shape else 1

    w32 = jnp.asarray(loss_weight, dtype=jnp.float32)

    # Fast path: typical DETLoss inputs are a few scalar losses; XLA fuses the
    # adds and a pallas_call launch would cost more than the whole computation.
    if size < min_pallas_elements:
        total = functools.reduce(
            operator.add, [v.astype(jnp.float32) for v in values]
        )
        return (w32 * total).astype(out_dtype)

    lane, pad = _choose_layout(size)
    flats = [jnp.ravel(v) for v in values]           # free for contiguous arrays
    if pad:
        # Rare path: element count not a multiple of 128.
        flats = [jnp.pad(f, (0, pad)) for f in flats]
    padded_size = size + pad
    rows = padded_size // lane
    flats_2d = [f.reshape(rows, lane) for f in flats]   # free reshape

    tr = _choose_row_tile(rows, lane, len(flats_2d))
    out_2d = _pallas_weighted_sum(flats_2d, w32.reshape(1), out_dtype, tr)

    out_flat = out_2d.reshape(-1)
    if pad:
        out_flat = out_flat[:size]
    return out_flat.reshape(out_shape)


if __name__ == "__main__":
    key = jax.random.PRNGKey(0)
    k = jax.random.split(key, 10)

    def ref_fn(d, w):
        return w * functools.reduce(operator.add, list(d.values()))

    # 1) Per-pixel loss maps (B=2, C=4, 16x16) -> Pallas path, single row block.
    d1 = {
        "loss_cls": jax.random.uniform(k[0], (2, 4, 16, 16), dtype=jnp.float32),
        "loss_bbox": jax.random.uniform(k[1], (2, 4, 16, 16), dtype=jnp.float32),
        "loss_iou": jax.random.uniform(k[2], (2, 4, 16, 16), dtype=jnp.float32),
    }
    o1 = jax.block_until_ready(det_loss(d1, loss_weight=0.5))
    r1 = ref_fn(d1, 0.5)
    assert o1.shape == r1.shape and o1.dtype == r1.dtype
    assert jnp.allclose(o1, r1, atol=1e-6, rtol=1e-6)

    # 2) Larger maps -> exercises row tiling over the parallel grid.
    d2 = {
        "loss_a": jax.random.normal(k[3], (5, 128, 256), dtype=jnp.float32),
        "loss_b": jax.random.normal(k[4], (5, 128, 256), dtype=jnp.float32),
        "loss_c": jax.random.normal(k[5], (5, 128, 256), dtype=jnp.float32),
    }
    o2 = jax.block_until_ready(det_loss(d2, loss_weight=1.7))
    r2 = ref_fn(d2, 1.7)
    assert jnp.allclose(o2, r2, atol=1e-5, rtol=1e-5)

    # 3) Element count not divisible by 128 -> minimal-pad fallback path.
    d3 = {
        "x": jax.random.uniform(k[6], (3, 7, 7, 19), dtype=jnp.float32),
        "y": jax.random.uniform(k[7], (3, 7, 7, 19), dtype=jnp.float32),
    }
    o3 = jax.block_until_ready(det_loss(d3, loss_weight=2.0))
    r3 = ref_fn(d3, 2.0)
    assert jnp.allclose(o3, r3, atol=1e-6, rtol=1e-6)

    # 4) bf16 losses -> f32 accumulation in-kernel, bf16 store.
    d4 = {
        "p": jax.random.normal(k[8], (2, 4, 32, 32), dtype=jnp.bfloat16),
        "q": jax.random.normal(k[9], (2, 4, 32, 32), dtype=jnp.bfloat16),
    }
    o4 = jax.block_until_ready(det_loss(d4, loss_weight=0.25))
    r4 = (0.25 * (d4["p"].astype(jnp.float32) + d4["q"].astype(jnp.float32))
          ).astype(jnp.bfloat16)
    assert o4.dtype == jnp.bfloat16
    assert jnp.allclose(o4.astype(jnp.float32), r4.astype(jnp.float32),
                        atol=2e-2, rtol=2e-2)

    # 5) Scalar losses (the typical PyTorch DETLoss use) -> tiny-input fast path.
    sd = {"a": jnp.float32(1.25), "b": jnp.float32(2.5), "c": jnp.float32(-0.75)}
    os_ = jax.block_until_ready(det_loss(sd, loss_weight=2.0))
    assert jnp.allclose(os_, 2.0 * (1.25 + 2.5 - 0.75), atol=1e-6, rtol=1e-6)

    # TODO(synk): integer-dtype losses are accumulated in f32 (differs from
    # PyTorch's exact integer accumulation above 2^24); irrelevant for real losses.

    print("KERNEL_OK")
</pallas_src>

<mosaic_0001>
module attributes {stable_mosaic.version = 11 : i64} {
  func.func @kernel(%arg0: i32, %arg1: memref<1xf32, #tpu.memory_space<smem>>, %arg2: memref<8x256xf32, #tpu.memory_space<vmem>>, %arg3: memref<8x256xf32, #tpu.memory_space<vmem>>, %arg4: memref<8x256xf32, #tpu.memory_space<vmem>>, %arg5: memref<8x256xf32, #tpu.memory_space<vmem>>) attributes {dimension_semantics = [#tpu.dimension_semantics<parallel>], iteration_bounds = array<i64: 1>, scalar_prefetch = 0 : i64, scratch_operands = 0 : i64, tpu.core_type = #tpu.core_type<tc>, window_params = [{transform_indices = @transform_0, window_bounds = array<i64: 1>}, {transform_indices = @transform_1, window_bounds = array<i64: 8, 256>}, {transform_indices = @transform_2, window_bounds = array<i64: 8, 256>}, {transform_indices = @transform_3, window_bounds = array<i64: 8, 256>}, {transform_indices = @transform_4, window_bounds = array<i64: 8, 256>}]} {
    %c0 = arith.constant 0 : index
    %c0_0 = arith.constant 0 : index
    %0 = vector.load %arg2[%c0, %c0_0] : memref<8x256xf32, #tpu.memory_space<vmem>>, vector<8x256xf32>
    %c0_1 = arith.constant 0 : index
    %c0_2 = arith.constant 0 : index
    %1 = vector.load %arg3[%c0_1, %c0_2] : memref<8x256xf32, #tpu.memory_space<vmem>>, vector<8x256xf32>
    %2 = arith.addf %0, %1 : vector<8x256xf32>
    %c0_3 = arith.constant 0 : index
    %c0_4 = arith.constant 0 : index
    %3 = vector.load %arg4[%c0_3, %c0_4] : memref<8x256xf32, #tpu.memory_space<vmem>>, vector<8x256xf32>
    %4 = arith.addf %2, %3 : vector<8x256xf32>
    %c0_5 = arith.constant 0 : index
    %5 = memref.load %arg1[%c0_5] : memref<1xf32, #tpu.memory_space<smem>>
    %6 = vector.broadcast %5 : f32 to vector<8x256xf32>
    %7 = arith.mulf %4, %6 : vector<8x256xf32>
    %c0_6 = arith.constant 0 : index
    %c0_7 = arith.constant 0 : index
    %8 = vector.load %arg5[%c0_6, %c0_7] : memref<8x256xf32, #tpu.memory_space<vmem>>, vector<8x256xf32>
    tpu.vector_store %arg5[%c0_6, %c0_7], %7 {strides = array<i32>} : memref<8x256xf32, #tpu.memory_space<vmem>>, vector<8x256xf32>,
    return
  }
  func.func @transform_0(%arg0: i32) -> i32 {
    %c0_i32 = arith.constant 0 : i32
    %c0_i32_0 = arith.constant 0 : i32
    return %c0_i32 : i32
  }
  func.func @transform_1(%arg0: i32) -> (i32, i32) {
    %c0_i32 = arith.constant 0 : i32
    %c0_i32_0 = arith.constant 0 : i32
    return %arg0, %c0_i32 : i32, i32
  }
  func.func @transform_2(%arg0: i32) -> (i32, i32) {
    %c0_i32 = arith.constant 0 : i32
    %c0_i32_0 = arith.constant 0 : i32
    return %arg0, %c0_i32 : i32, i32
  }
  func.func @transform_3(%arg0: i32) -> (i32, i32) {
    %c0_i32 = arith.constant 0 : i32
    %c0_i32_0 = arith.constant 0 : i32
    return %arg0, %c0_i32 : i32, i32
  }
  func.func @transform_4(%arg0: i32) -> (i32, i32) {
    %c0_i32 = arith.constant 0 : i32
    %c0_i32_0 = arith.constant 0 : i32
    return %arg0, %c0_i32 : i32, i32
  }
}

</mosaic_0001>

<bundles_post_ra>
// kernel: tpu_custom_call.1
= control target key start
LH: loop header
LB: loop body
LE: loop exit
PB: predicated region body
PF: predicated region fallthrough
CT: control target
= control target key end

     0   :  { %10 = vsyncpa [#allocation4], 0  ;;  %s264_s0 = inlined_call_operand.<no memory space> [shape: f32[1], index: 0, kind: input, shape index: {}]   ;;  %s265_s1 = inlined_call_operand.hbm [shape: f32[8,256], index: 1, kind: input, shape index: {}]   ;;  %s266_s2 = inlined_call_operand.hbm [shape: f32[8,256], index: 2, kind: input, shape index: {}]   ;;  %s267_s3 = inlined_call_operand.hbm [shape: f32[8,256], index: 3, kind: input, shape index: {}]   ;;  %s268_s4 = inlined_call_operand.hbm [shape: f32[8,256], index: 4, kind: output, shape index: {}]  }
   0x1   :  { %11 = vsyncpa [#allocation7], 0 }
   0x2   :  { %12 = vsyncpa [#allocation5], 0  ;;  %s184_s15 = smov [#allocation6]   ;;  %s185_s17 = smov [#allocation3]  }
   0x3   :  { %s31_s16 = sshll.u32 %s184_s15, 4  ;;  %s21_s18 = sshll.u32 %s185_s17, 4  ;;  %s32_s16 = int_to_ptr.vmem [resolvable:$true] %s31_s16  ;;  %s22_s18 = int_to_ptr.vmem [resolvable:$true] %s21_s18 }
   0x4   :  { %s90_s21 = scalar_lea.hbm %s266_s2, 256 }
   0x5   :  { %p91_p0 = scmp.ne.s32.totalorder %s266_s2, %s90_s21  ;;  %p94_p1 = scmp.lt.u32.totalorder %s90_s21, %s266_s2 }
   0x7   :  { %p96_p2 = pnand %p94_p1, %p91_p0 }
   0x9   :  { %99 = shalt.err (!%p96_p2)
}
   0xa   :  { %s100_s26 = scalar_lea.vmem %s32_s16, 256  ;;  %p105_p4 = scmp.lt.s32.totalorder %s32_s16, %s32_s16 }
   0xb   :  { %p101_p3 = scmp.ne.s32.totalorder %s32_s16, %s100_s26  ;;  %p106_p5 = scmp.lt.s32.totalorder %s100_s26, %s100_s26 }
   0xd   :  { %p107_p6 = por %p106_p5, %p105_p4 }
   0xf   :  { %p108_p7 = pnand %p107_p6, %p101_p3 }
  0x11   :  { %111 = shalt.err (!%p108_p7)
}
  0x12   :  { %34 = dma.hbm_to_vmem [thread:$0]  %s266_s2, 256, %s32_s16, [#allocation7]  }
  0x13   :  { %s112_s5 = scalar_lea.hbm %s265_s1, 256 }
  0x14   :  { %p113_p8 = scmp.ne.s32.totalorder %s265_s1, %s112_s5  ;;  %p116_p9 = scmp.lt.u32.totalorder %s112_s5, %s265_s1 }
  0x16   :  { %p118_p10 = pnand %p116_p9, %p113_p8 }
  0x18   :  { %121 = shalt.err (!%p118_p10)
}
  0x19   :  { %s122_s10 = scalar_lea.vmem %s22_s18, 256  ;;  %p127_p12 = scmp.lt.s32.totalorder %s22_s18, %s22_s18 }
  0x1a   :  { %p123_p11 = scmp.ne.s32.totalorder %s22_s18, %s122_s10  ;;  %p128_p13 = scmp.lt.s32.totalorder %s122_s10, %s122_s10 }
  0x1c   :  { %p129_p0 = por %p128_p13, %p127_p12 }
  0x1e   :  { %p130_p1 = pnand %p129_p0, %p123_p11 }
  0x20   :  { %133 = shalt.err (!%p130_p1)
}
  0x21   :  { %24 = dma.hbm_to_vmem [thread:$0]  %s265_s1, 256, %s22_s18, [#allocation4]  }
  0x22   :  { %s186_s12 = smov [#allocation8]   ;;  %s134_s16 = scalar_lea.hbm %s267_s3, 256 }
  0x23   :  { %s41_s13 = sshll.u32 %s186_s12, 4  ;;  %p135_p2 = scmp.ne.s32.totalorder %s267_s3, %s134_s16  ;;  %s42_s13 = int_to_ptr.vmem [resolvable:$true] %s41_s13 }
  0x24   :  { %p138_p3 = scmp.lt.u32.totalorder %s134_s16, %s267_s3 }
  0x26   :  { %p140_p4 = pnand %p138_p3, %p135_p2 }
  0x28   :  { %143 = shalt.err (!%p140_p4)
}
  0x29   :  { %s144_s22 = scalar_lea.vmem %s42_s13, 256  ;;  %p149_p6 = scmp.lt.s32.totalorder %s42_s13, %s42_s13 }
  0x2a   :  { %p145_p5 = scmp.ne.s32.totalorder %s42_s13, %s144_s22  ;;  %p150_p7 = scmp.lt.s32.totalorder %s144_s22, %s144_s22 }
  0x2c   :  { %p151_p8 = por %p150_p7, %p149_p6 }
  0x2e   :  { %p152_p9 = pnand %p151_p8, %p145_p5 }
  0x30   :  { %155 = shalt.err (!%p152_p9)
}
  0x31   :  { %44 = dma.hbm_to_vmem [thread:$0]  %s267_s3, 256, %s42_s13, [#allocation7]  }
  0x32   :  { %178 = dma.done.wait [#allocation4], 256  }
  0x33   :  { %179 = vsyncadd [#allocation4], 4294967040 }
  0x34   :  { %180 = dma.done.wait [#allocation7], 512  }
  0x35   :  { %181 = vsyncadd [#allocation7], 4294966784  ;;  %v54_v0 = vld [vmem:[#allocation3] sm:$0xff]  ;;  %v56_v1 = vld [vmem:[#allocation6] sm:$0xff]  ;;  %v65_v7 = vstv %s264_s0  ;;  %s187_s25 = smov [#allocation9]  }
  0x36   :  { %v60_v2 = vld [vmem:[#allocation8] sm:$0xff]  ;;  %v58_v3 = vadd.f32 %v56_v1, %v54_v0  ;;  %v55_v4 = vld [vmem:[#allocation3 + $0x8] sm:$0xff]  ;;  %v57_v5 = vld [vmem:[#allocation6 + $0x8] sm:$0xff]  ;;  %s76_s26 = sshll.u32 %s187_s25, 4  ;;  %s77_s26 = int_to_ptr.vmem [resolvable:$true] %s76_s26 }
  0x37   :  { %v61_v6 = vld [vmem:[#allocation8 + $0x8] sm:$0xff]  ;;  %v59_v8 = vadd.f32 %v57_v5, %v55_v4  ;;  %s156_s3 = scalar_lea.vmem %s77_s26, 256  ;;  %p161_p11 = scmp.lt.s32.totalorder %s77_s26, %s77_s26 }
  0x38   :  { %v62_v9 = vadd.f32 %v60_v2, %v58_v3  ;;  %p157_p10 = scmp.ne.s32.totalorder %s77_s26, %s156_s3  ;;  %p162_p12 = scmp.lt.s32.totalorder %s156_s3, %s156_s3 }
  0x39   :  { %v63_v10 = vadd.f32 %v61_v6, %v59_v8 }
  0x3a   :  { %v66_v11 = vmul.f32 %v65_v7, %v62_v9  ;;  %p163_p13 = por %p162_p12, %p161_p11 }
  0x3b   :  { %v67_v12 = vmul.f32 %v65_v7, %v63_v10 }
  0x3c   :  { %68 = vst [vmem:[#allocation9] sm:$0xff] %v66_v11  ;;  %p164_p0 = pnand %p163_p13, %p157_p10 }
  0x3d   :  { %69 = vst [vmem:[#allocation9 + $0x8] sm:$0xff] %v67_v12 }
  0x3e   :  { %167 = shalt.err (!%p164_p0)
}
  0x3f   :  { %s168_s0 = scalar_lea.hbm %s268_s4, 256 }
  0x40   :  { %p169_p1 = scmp.ne.s32.totalorder %s268_s4, %s168_s0  ;;  %p172_p2 = scmp.lt.u32.totalorder %s168_s0, %s268_s4 }
  0x42   :  { %p174_p3 = pnand %p172_p2, %p169_p1 }
  0x44   :  { %177 = shalt.err (!%p174_p3)
}
  0x45   :  { %79 = dma.vmem_to_hbm [thread:$0]  %s77_s26, 256, %s268_s4, [#allocation5]  }
  0x46   :  { %182 = dma.done.wait [#allocation5], 256  }
  0x47   :  { %183 = vsyncadd [#allocation5], 4294967040 }
  0x48   :  { %83 = vsyncpa [#allocation4], 1 }
  0x49   :  { %84 = vsyncpa [#allocation7], 1 }
  0x4a   :  { %85 = vsyncpa [#allocation5], 1 }

</bundles_post_ra>
